<compile_context>
chip_gen: v5e
topology: v5e:2x2
jax: 0.10.0
libtpu: 0.0.40
codegen_flags: <defaults>
</compile_context>

<pallas_src>
import functools

import jax
import jax.numpy as jnp
from jax.experimental import pallas as pl
from jax.experimental.pallas import tpu as pltpu

EPS = 1e-5
LANE = 128
FUSED_MAX_BYTES = 8 * 1024 * 1024    # use the fused path while x comfortably fits in VMEM
BLOCK_BYTES = 4 * 1024 * 1024        # streaming path: ~4 MiB row tiles
NSLICE = 2                           # stats partial-sum slices (dual-TC on v7x)
VMEM_LIMIT = 40 * 1024 * 1024        # sized against v7x (64 MiB physical VMEM)


def _cdiv(a, b):
    return -(-a // b)


def _round_up(a, b):
    return _cdiv(a, b) * b


def _pick_lanes(hwp):
    """Widest lane count (multiple of 128) that exactly tiles one (n, c) slab."""
    for lw in (1024, 512, 256, 128):
        if hwp % lw == 0:
            return lw
    return LANE


# ----------------------------------------------------------------------------
# Fused path: whole array VMEM-resident, one kernel launch, centered variance.
# ----------------------------------------------------------------------------
def _fused_kernel(x_ref, o_ref, *, inv_count):
    x = x_ref[...]                                                  # (N, C, HW) f32
    s = jnp.sum(jnp.sum(x, axis=2, keepdims=True), axis=0, keepdims=True)
    mean = s * inv_count                                            # (1, C, 1)
    xc = x - mean
    v = jnp.sum(jnp.sum(xc * xc, axis=2, keepdims=True), axis=0, keepdims=True)
    inv_std = jax.lax.rsqrt(jnp.maximum(v * inv_count, 0.0) + EPS)  # (1, C, 1)
    o_ref[...] = (xc * inv_std).astype(o_ref.dtype)


# ----------------------------------------------------------------------------
# Streaming path, pass 1: per-channel partial sum / sum-of-squares.
# Grid = (NSLICE "parallel", tiles "arbitrary"); accumulators in VMEM scratch.
# ----------------------------------------------------------------------------
def _stats_kernel(chan_ref, x_ref, psum_ref, psq_ref, acc_s_ref, acc_q_ref,
                  *, C, TR, R, TPS):
    sl = pl.program_id(0)        # stats slice (dual-TC sharding on v7x)
    step = pl.program_id(1)      # reduction axis

    @pl.when(step == 0)
    def _init():
        acc_s_ref[...] = jnp.zeros_like(acc_s_ref)
        acc_q_ref[...] = jnp.zeros_like(acc_q_ref)

    x = x_ref[...]               # (TR, LW) f32
    chan = chan_ref[...]         # (TR, 1)  int32 channel id per row
    # Global row index of this tile (unclamped) -> masks ragged / overrun tiles.
    row = (sl * TPS + step) * TR + jax.lax.broadcasted_iota(jnp.int32, (TR, 1), 0)
    valid = row < R

    # C == 2 for this module: cheap static unroll.  (For large C this would be
    # replaced by a one_hot(chan)^T @ [x, x*x] MXU contraction.)
    for c in range(C):
        sel = jnp.logical_and(valid, chan == c)
        xc = jnp.where(sel, x, 0.0)
        acc_s_ref[pl.ds(c, 1), :] += jnp.sum(xc, axis=0, keepdims=True)
        acc_q_ref[pl.ds(c, 1), :] += jnp.sum(xc * xc, axis=0, keepdims=True)

    @pl.when(step == pl.num_programs(1) - 1)
    def _finalize():
        psum_ref[...] = jnp.sum(acc_s_ref[...], axis=1, keepdims=True)   # (C, 1)
        psq_ref[...] = jnp.sum(acc_q_ref[...], axis=1, keepdims=True)    # (C, 1)


# ----------------------------------------------------------------------------
# Streaming path, pass 2: y = (x - mean_c) * inv_std_c.
# mean / inv_std are tiny SMEM scalar tables -> no gather, no (R,1) f32 arrays.
# ----------------------------------------------------------------------------
def _normalize_kernel(mean_ref, istd_ref, chan_ref, x_ref, o_ref, *, C):
    x = x_ref[...]               # (TR, LW)
    chan = chan_ref[...]         # (TR, 1)
    mu = jnp.zeros(chan.shape, jnp.float32)
    isd = jnp.zeros(chan.shape, jnp.float32)
    for c in range(C):           # static unroll; SMEM scalar splats
        sel = chan == c
        mu = jnp.where(sel, mean_ref[c, 0], mu)
        isd = jnp.where(sel, istd_ref[c, 0], isd)
    o_ref[...] = ((x - mu) * isd).astype(o_ref.dtype)


# ----------------------------------------------------------------------------
# Wrapper
# ----------------------------------------------------------------------------
def batchnorm2d_pallas(x, *, force_two_pass=False, block_bytes=BLOCK_BYTES):
    """x: (N, C, H, W) -> BatchNorm2d(affine=False) forward using batch stats."""
    N, C, H, W = x.shape
    x = x.astype(jnp.float32)
    HW = H * W
    total = N * C * HW
    inv_count = 1.0 / float(N * HW)      # true per-channel element count

    # ---- fused path: single kernel, everything resident in VMEM ------------
    if (not force_two_pass) and total * 4 <= FUSED_MAX_BYTES:
        x3 = x.reshape(N, C, HW)                       # free reshape (NCHW contiguous)
        y3 = pl.pallas_call(
            functools.partial(_fused_kernel, inv_count=inv_count),
            out_shape=jax.ShapeDtypeStruct((N, C, HW), jnp.float32),
            compiler_params=pltpu.CompilerParams(vmem_limit_bytes=VMEM_LIMIT),
        )(x3)
        return y3.reshape(N, C, H, W)

    # ---- streaming two-pass path (large x) ----------------------------------
    x3 = x.reshape(N, C, HW)
    HWp = _round_up(HW, LANE)
    if HWp != HW:
        # TODO(synk): ragged H*W tail costs one pad copy; kept because the zero
        # padding is stats-neutral (inv_count uses the true N*H*W count).
        x3 = jnp.pad(x3, ((0, 0), (0, 0), (0, HWp - HW)))
    LW = _pick_lanes(HWp)                # widest lane count dividing a slab
    RS = HWp // LW                       # rows per (n, c) slab
    R = N * C * RS                       # total data rows
    x2 = x3.reshape(R, LW)               # free reshape, fully lane-dense rows

    TR = (max(block_bytes, 8 * LW * 4) // (LW * 4)) // 8 * 8   # multiple of 8
    TR = min(TR, R)                      # or the full row count (allowed)
    NT = _cdiv(R, TR)                    # data tiles (ragged tail masked in-kernel)
    TPS = _cdiv(NT, NSLICE)              # tiles per parallel stats slice

    # Tiny shape-only per-row channel table (~1/LW of the data traffic).
    chan_rows = ((jnp.arange(R, dtype=jnp.int32) // RS) % C)[:, None]

    # pass 1: per-channel partial sums / sums of squares (NSLICE slices)
    kern1 = functools.partial(_stats_kernel, C=C, TR=TR, R=R, TPS=TPS)
    psum, psq = pl.pallas_call(
        kern1,
        out_shape=(jax.ShapeDtypeStruct((NSLICE, C, 1), jnp.float32),
                   jax.ShapeDtypeStruct((NSLICE, C, 1), jnp.float32)),
        grid=(NSLICE, TPS),
        in_specs=[
            pl.BlockSpec((TR, 1), lambda s, t: (jnp.minimum(s * TPS + t, NT - 1), 0)),
            pl.BlockSpec((TR, LW), lambda s, t: (jnp.minimum(s * TPS + t, NT - 1), 0)),
        ],
        out_specs=(pl.BlockSpec((None, C, 1), lambda s, t: (s, 0, 0)),
                   pl.BlockSpec((None, C, 1), lambda s, t: (s, 0, 0))),
        scratch_shapes=[pltpu.VMEM((C, LW), jnp.float32),
                        pltpu.VMEM((C, LW), jnp.float32)],
        compiler_params=pltpu.CompilerParams(
            dimension_semantics=("parallel", "arbitrary"),
            vmem_limit_bytes=VMEM_LIMIT),
    )(chan_rows, x2)

    # Negligible (NSLICE, C, 1) combine of the per-slice partials.
    s = jnp.sum(psum, axis=0)                              # (C, 1)
    q = jnp.sum(psq, axis=0)                               # (C, 1)
    mean = s * inv_count
    var = jnp.maximum(q * inv_count - mean * mean, 0.0)    # biased variance, clamped
    inv_std = jax.lax.rsqrt(var + EPS)

    # pass 2: normalize; mean / inv_std travel as SMEM scalars (no gathers).
    kern2 = functools.partial(_normalize_kernel, C=C)
    y2 = pl.pallas_call(
        kern2,
        out_shape=jax.ShapeDtypeStruct((R, LW), jnp.float32),
        grid=(NT,),
        in_specs=[
            pl.BlockSpec(memory_space=pltpu.MemorySpace.SMEM),   # mean (C, 1)
            pl.BlockSpec(memory_space=pltpu.MemorySpace.SMEM),   # inv_std (C, 1)
            pl.BlockSpec((TR, 1), lambda t: (t, 0)),
            pl.BlockSpec((TR, LW), lambda t: (t, 0)),
        ],
        out_specs=pl.BlockSpec((TR, LW), lambda t: (t, 0)),
        compiler_params=pltpu.CompilerParams(
            dimension_semantics=("parallel",),
            vmem_limit_bytes=VMEM_LIMIT),
    )(mean, inv_std, chan_rows, x2)

    y = y2.reshape(N, C, HWp)
    if HWp != HW:
        y = y[:, :, :HW]
    return y.reshape(N, C, H, W)


# TODO(synk): nn.BatchNorm2d in training mode also updates running_mean /
# running_var buffers; only the normalized output is produced here.


def _reference(x):
    mean = jnp.mean(x, axis=(0, 2, 3), keepdims=True)
    var = jnp.mean((x - mean) ** 2, axis=(0, 2, 3), keepdims=True)
    return (x - mean) / jnp.sqrt(var + EPS)


if __name__ == "__main__":
    # BatchNorm2d(2) => channels must be 2
    key = jax.random.PRNGKey(0)
    x = jax.random.normal(key, (2, 2, 16, 16), dtype=jnp.float32)

    # fused (VMEM-resident) path — the one the target shape exercises
    y = batchnorm2d_pallas(x)
    jax.block_until_ready(y)
    assert y.shape == x.shape and y.dtype == jnp.float32
    assert jnp.max(jnp.abs(y - _reference(x))) < 1e-4

    # streaming two-pass path: multi-tile + ragged last tile + both stats slices
    xa = jax.random.normal(jax.random.PRNGKey(1), (2, 2, 32, 48), dtype=jnp.float32)
    ya = batchnorm2d_pallas(xa, force_two_pass=True, block_bytes=4096)
    jax.block_until_ready(ya)
    assert jnp.max(jnp.abs(ya - _reference(xa))) < 1e-4

    # streaming path: single-tile-per-slice / clamped overrun slice case
    xb = jax.random.normal(jax.random.PRNGKey(2), (2, 2, 32, 32), dtype=jnp.float32)
    yb = batchnorm2d_pallas(xb, force_two_pass=True)
    jax.block_until_ready(yb)
    assert jnp.max(jnp.abs(yb - _reference(xb))) < 1e-4

    print("KERNEL_OK")
</pallas_src>

<mosaic_0001>
module attributes {stable_mosaic.version = 11 : i64} {
  func.func @_fused_kernel(%arg0: memref<2x2x256xf32, #tpu.memory_space<vmem>>, %arg1: memref<2x2x256xf32, #tpu.memory_space<vmem>>) attributes {dimension_semantics = [], scalar_prefetch = 0 : i64, scratch_operands = 0 : i64, tpu.core_type = #tpu.core_type<tc>} {
    %c0 = arith.constant 0 : index
    %c0_0 = arith.constant 0 : index
    %c0_1 = arith.constant 0 : index
    %0 = vector.load %arg0[%c0, %c0_0, %c0_1] : memref<2x2x256xf32, #tpu.memory_space<vmem>>, vector<2x2x256xf32>
    %cst = arith.constant dense<0.000000e+00> : vector<2x2xf32>
    %1 = vector.multi_reduction <add>, %0, %cst [2] : vector<2x2x256xf32> to vector<2x2xf32>
    %2 = vector.shape_cast %1 : vector<2x2xf32> to vector<2x2x1xf32>
    %cst_2 = arith.constant dense<0.000000e+00> : vector<2x1xf32>
    %3 = vector.multi_reduction <add>, %2, %cst_2 [0] : vector<2x2x1xf32> to vector<2x1xf32>
    %4 = vector.shape_cast %3 : vector<2x1xf32> to vector<1x2x1xf32>
    %cst_3 = arith.constant 0.001953125 : f32
    %5 = vector.broadcast %cst_3 : f32 to vector<1x2x1xf32>
    %6 = arith.mulf %4, %5 : vector<1x2x1xf32>
    %7 = vector.broadcast %6 : vector<1x2x1xf32> to vector<2x2x256xf32>
    %8 = arith.subf %0, %7 : vector<2x2x256xf32>
    %9 = arith.mulf %8, %8 : vector<2x2x256xf32>
    %cst_4 = arith.constant dense<0.000000e+00> : vector<2x2xf32>
    %10 = vector.multi_reduction <add>, %9, %cst_4 [2] : vector<2x2x256xf32> to vector<2x2xf32>
    %11 = vector.shape_cast %10 : vector<2x2xf32> to vector<2x2x1xf32>
    %cst_5 = arith.constant dense<0.000000e+00> : vector<2x1xf32>
    %12 = vector.multi_reduction <add>, %11, %cst_5 [0] : vector<2x2x1xf32> to vector<2x1xf32>
    %13 = vector.shape_cast %12 : vector<2x1xf32> to vector<1x2x1xf32>
    %cst_6 = arith.constant 0.001953125 : f32
    %14 = vector.broadcast %cst_6 : f32 to vector<1x2x1xf32>
    %15 = arith.mulf %13, %14 : vector<1x2x1xf32>
    %cst_7 = arith.constant 0.000000e+00 : f32
    %16 = vector.broadcast %cst_7 : f32 to vector<1x2x1xf32>
    %17 = arith.maximumf %15, %16 : vector<1x2x1xf32>
    %cst_8 = arith.constant 9.99999974E-6 : f32
    %18 = vector.broadcast %cst_8 : f32 to vector<1x2x1xf32>
    %19 = arith.addf %17, %18 : vector<1x2x1xf32>
    %20 = math.rsqrt %19 : vector<1x2x1xf32>
    %21 = vector.broadcast %20 : vector<1x2x1xf32> to vector<2x2x256xf32>
    %22 = arith.mulf %8, %21 : vector<2x2x256xf32>
    %c0_9 = arith.constant 0 : index
    %c0_10 = arith.constant 0 : index
    %c0_11 = arith.constant 0 : index
    %23 = vector.load %arg1[%c0_9, %c0_10, %c0_11] : memref<2x2x256xf32, #tpu.memory_space<vmem>>, vector<2x2x256xf32>
    tpu.vector_store %arg1[%c0_9, %c0_10, %c0_11], %22 {strides = array<i32>} : memref<2x2x256xf32, #tpu.memory_space<vmem>>, vector<2x2x256xf32>,
    return
  }
}

</mosaic_0001>

<bundles_post_ra>
// kernel: tpu_custom_call.1
= control target key start
LH: loop header
LB: loop body
LE: loop exit
PB: predicated region body
PF: predicated region fallthrough
CT: control target
= control target key end

     0   :  { %6 = vsyncpa [#allocation3], 0  ;;  %s231_s0 = inlined_call_operand.hbm [shape: f32[2,2,256], index: 0, kind: input, shape index: {}]   ;;  %s232_s1 = inlined_call_operand.hbm [shape: f32[2,2,256], index: 1, kind: output, shape index: {}]  }
   0x1   :  { %7 = vsyncpa [#allocation4], 0  ;;  %s12_s8 = sshll.u32 %s231_s0, 4  ;;  %s192_s9 = smov [#allocation2]   ;;  %s13_s8 = int_to_ptr.hbm [resolvable:$true] %s12_s8 }
   0x2   :  { %s14_s10 = sshll.u32 %s192_s9, 4  ;;  %s193_s11 = smov 64   ;;  %s15_s10 = int_to_ptr.vmem [resolvable:$true] %s14_s10 }
   0x3   :  { %s194_s12 = smov 4  }
   0x4   :  { %20 = dma.hbm_to_vmem [thread:$0]  %s13_s8, 128, %s15_s10, [#allocation3], %s193_s11, %s193_s11, %s194_s12  }
   0x5   :  { %188 = dma.done.wait [#allocation3], 128  }
   0x6   :  { %189 = vsyncadd [#allocation3], 4294967168  ;;  %v25_v0 = vld [vmem:[#allocation2] sm:$0xf]  ;;  %v26_v1 = vld [vmem:[#allocation2 + $0x4] sm:$0xf] }
   0x7   :  { %29 = vst [vmem:[#allocation1] ss:$4 sm:$0xff] %v25_v0  ;;  %vm40_vm0 = vcmask 1041408   ;;  %v195_v13 = vmov 269488144   ;;  %s196_s0 = smov [#allocation5]  }
   0x8   :  { %33 = vst [vmem:[#allocation1 + $0x20] ss:$4 sm:$0xff] %v26_v1  ;;  %v57_v14 = vunpack.c.l.s4 %v195_v13  ;;  %s118_s13 = sshll.u32 %s196_s0, 4  ;;  %s120_s16 = sshll.u32 %s232_s1, 4  ;;  %s119_s13 = int_to_ptr.vmem [resolvable:$true] %s118_s13  ;;  %s121_s16 = int_to_ptr.hbm [resolvable:$true] %s120_s16 }
   0xa   :  { %v58_v18 = vunpack.c.0.s8 %v57_v14 }
   0xe   :  { %v30_v2 = vld.sshfl [vmem:[#allocation1] sm:$0xff pattern:$0x73625140]  ;;  %v31_v3 = vld.sshfl [vmem:[#allocation1 + $0x8] sm:$0xff pattern:$0x73625140] }
   0xf   :  { %v41_v4 = vsel %vm40_vm0, %v30_v2, 0.0  ;;  %v42_v5 = vsel %vm40_vm0, %v31_v3, 0.0  ;;  %v34_v7 = vld.sshfl [vmem:[#allocation1 + $0x20] sm:$0xff pattern:$0x73625140] }
  0x10   :  { %v43_v6 = vadd.f32 %v42_v5, %v41_v4  ;;  %v35_v8 = vld.sshfl [vmem:[#allocation1 + $0x28] sm:$0xff pattern:$0x73625140]  ;;  %v46_v9 = vsel %vm40_vm0, %v34_v7, 0.0 }
  0x11   :  { %v47_v10 = vsel %vm40_vm0, %v35_v8, 0.0 }
  0x12   :  { %44 = vadd.xlane.f32.xlu0 %v43_v6  ;;  %v48_v11 = vadd.f32 %v47_v10, %v46_v9 }
  0x1a   :  { %49 = vadd.xlane.f32.xlu0 %v48_v11 }
  0x85   :  { %v45_v12 = vpop.xlane.xlu0 %44 }
  0x86   :  { %v51_v16 = vsel %vm40_vm0, %v45_v12, 0.0 }
  0x8d   :  { %v50_v15 = vpop.xlane.xlu0 %49 }
  0x8e   :  { %v52_v17 = vsel %vm40_vm0, %v50_v15, 0.0 }
  0x8f   :  { %v53_v19 = vadd.f32 %v52_v17, %v51_v16 }
  0x91   :  { %v54_v20 = vmul.f32 0.001953125, %v53_v19 }
  0x93   :  { %v59_v21 = vperm.slane %v54_v20, %v58_v18 }
  0x95   :  { %v61_v22 = vsub.f32 %v25_v0, %v59_v21  ;;  %v62_v23 = vsub.f32 %v26_v1, %v59_v21 }
  0x97   :  { %v63_v24 = vmul.f32 %v61_v22, %v61_v22  ;;  %v64_v25 = vmul.f32 %v62_v23, %v62_v23 }
  0x99   :  { %67 = vst [vmem:[#allocation1] ss:$4 sm:$0xff] %v63_v24 }
  0x9a   :  { %71 = vst [vmem:[#allocation1 + $0x20] ss:$4 sm:$0xff] %v64_v25 }
  0xa0   :  { %v68_v26 = vld.sshfl [vmem:[#allocation1] sm:$0xff pattern:$0x73625140]  ;;  %v69_v27 = vld.sshfl [vmem:[#allocation1 + $0x8] sm:$0xff pattern:$0x73625140] }
  0xa1   :  { %v78_v28 = vsel %vm40_vm0, %v68_v26, 0.0  ;;  %v79_v29 = vsel %vm40_vm0, %v69_v27, 0.0  ;;  %v72_v31 = vld.sshfl [vmem:[#allocation1 + $0x20] sm:$0xff pattern:$0x73625140] }
  0xa2   :  { %v80_v30 = vadd.f32 %v79_v29, %v78_v28  ;;  %v73_v32 = vld.sshfl [vmem:[#allocation1 + $0x28] sm:$0xff pattern:$0x73625140]  ;;  %v83_v33 = vsel %vm40_vm0, %v72_v31, 0.0 }
  0xa3   :  { %v84_v34 = vsel %vm40_vm0, %v73_v32, 0.0 }
  0xa4   :  { %81 = vadd.xlane.f32.xlu1 %v80_v30  ;;  %v85_v35 = vadd.f32 %v84_v34, %v83_v33 }
  0xac   :  { %86 = vadd.xlane.f32.xlu1 %v85_v35 }
 0x117   :  { %v82_v36 = vpop.xlane.xlu1 %81 }
 0x118   :  { %v88_v38 = vsel %vm40_vm0, %v82_v36, 0.0 }
 0x11f   :  { %v87_v37 = vpop.xlane.xlu1 %86 }
 0x120   :  { %v89_v39 = vsel %vm40_vm0, %v87_v37, 0.0 }
 0x121   :  { %v90_v40 = vadd.f32 %v89_v39, %v88_v38 }
 0x123   :  { %v91_v41 = vmul.f32 0.001953125, %v90_v40 }
 0x125   :  { %v92_v42 = vmax.f32 %v91_v41, 0.0 }
 0x127   :  { %v93_v43 = vadd.f32 1e-05, %v92_v42 }
 0x129   :  { %138 = vrsqrt.f32 %v93_v43  ;;  %vm100_vm2 = vweird.f32 %v93_v43 }
 0x12f   :  { %v139_v44 = vpop.eup %138 }
 0x130   :  { %v95_v45 = vmul.f32 %v139_v44, %v93_v43  ;;  %vm101_vm1 = vweird.f32 %v139_v44 }
 0x131   :  { %vm102_vm3 = vmor %vm100_vm2, %vm101_vm1 }
 0x132   :  { %v96_v46 = vmul.f32 %v139_v44, %v95_v45 }
 0x134   :  { %v97_v47 = vmul.f32 0.5, %v96_v46 }
 0x136   :  { %v98_v48 = vsub.f32 1.5, %v97_v47 }
 0x138   :  { %v99_v49 = vmul.f32 %v139_v44, %v98_v48 }
 0x13a   :  { %v103_v50 = vsel %vm102_vm3, %v139_v44, %v99_v49 }
 0x13b   :  { %v108_v51 = vperm.slane %v103_v50, %v58_v18 }
 0x13d   :  { %v110_v52 = vmul.f32 %v108_v51, %v61_v22  ;;  %v111_v53 = vmul.f32 %v108_v51, %v62_v23 }
 0x13f   :  { %112 = vst [vmem:[#allocation5] sm:$0xf] %v110_v52 }
 0x140   :  { %113 = vst [vmem:[#allocation5 + $0x4] sm:$0xf] %v111_v53 }
 0x141   :  { %126 = dma.vmem_to_hbm [thread:$0]  %s119_s13, 128, %s121_s16, [#allocation4], %s193_s11, %s193_s11, %s194_s12  }
 0x142   :  { %190 = dma.done.wait [#allocation4], 128  }
 0x143   :  { %191 = vsyncadd [#allocation4], 4294967168 }
 0x144   :  { %131 = vsyncpa [#allocation3], 1 }
 0x145   :  { %132 = vsyncpa [#allocation4], 1 }

</bundles_post_ra>
